<compile_context>
chip_gen: v7x
topology: tpu7x:2x2x1
jax: 0.10.0
libtpu: 0.0.40
codegen_flags: <defaults>
</compile_context>

<pallas_src>
import math
import random

import numpy as np
import jax
import jax.numpy as jnp
from jax.experimental import pallas as pl
from jax.experimental.pallas import tpu as pltpu


_LANES = 128        # lane width: output padded to full-lane stores
_MAX_TM = 1024      # frames per grid step (MXU M dimension)


# ----------------------------------------------------------------------------
# Host-side construction of the tiny polyphase sinc kernel (numpy, O(new*kwidth))
# ----------------------------------------------------------------------------
def _sinc_resample_kernel(orig: int, new: int,
                          lowpass_filter_width: int = 6,
                          rolloff: float = 0.99):
    """Windowed-sinc polyphase kernel, shape (new, kwidth), kwidth = 2*width+orig."""
    base_freq = min(orig, new) * rolloff
    width = int(math.ceil(lowpass_filter_width * orig / base_freq))
    idx = np.arange(-width, width + orig, dtype=np.float64) / orig
    t = (np.arange(0, -new, -1, dtype=np.float64)[:, None] / new) + idx[None, :]
    t = t * base_freq
    t = np.clip(t, -lowpass_filter_width, lowpass_filter_width)
    window = np.cos(t * math.pi / lowpass_filter_width / 2.0) ** 2
    tpi = t * math.pi
    scale = base_freq / orig
    safe = np.where(tpi == 0.0, 1.0, tpi)
    kern = np.where(tpi == 0.0, 1.0, np.sin(safe) / safe)
    kern = kern * window * scale
    return kern.astype(np.float32), width


# ----------------------------------------------------------------------------
# Pallas kernel: per grid step, (tm, kw_p) @ (kw_p, 128) on the MXU,
# f32 accumulation, full-lane (128) unmasked output stores.
# ----------------------------------------------------------------------------
def _poly_matmul_kernel(frames_ref, kt_ref, o_ref):
    o_ref[...] = jnp.dot(frames_ref[...], kt_ref[...],
                         preferred_element_type=jnp.float32)


def _polyphase_resample_pallas(frames: jax.Array, kt_pad: jax.Array,
                               tm: int) -> jax.Array:
    n_frames_p, kw_p = frames.shape
    _, new_p = kt_pad.shape
    grid = (n_frames_p // tm,)
    return pl.pallas_call(
        _poly_matmul_kernel,
        out_shape=jax.ShapeDtypeStruct((n_frames_p, new_p), jnp.float32),
        grid_spec=pltpu.PrefetchScalarGridSpec(
            num_scalar_prefetch=0,
            grid=grid,
            in_specs=[
                # frame tile streamed per grid step
                pl.BlockSpec((tm, kw_p), lambda i: (i, 0)),
                # tiny filter block: constant index_map -> stays VMEM-resident
                pl.BlockSpec((kw_p, new_p), lambda i: (0, 0)),
            ],
            out_specs=pl.BlockSpec((tm, new_p), lambda i: (i, 0)),
        ),
        compiler_params=pltpu.CompilerParams(
            dimension_semantics=("parallel",)),
    )(frames, kt_pad)


# ----------------------------------------------------------------------------
# Module
# ----------------------------------------------------------------------------
class SpeechPreprocessSpeedPerturb:
    """JAX/Pallas port of the FunASR SpeechPreprocessSpeedPerturb module."""

    def __init__(self, speed_perturb=None, compute_dtype=jnp.bfloat16, **kwargs):
        self.speed_perturb = speed_perturb
        # bf16 halves HBM traffic; accumulation stays f32 on the MXU.
        # TODO(synk): set compute_dtype=jnp.float32 if ~1e-2 abs error matters.
        self.compute_dtype = compute_dtype

    def forward(self, waveform, fs, **kwargs):
        if self.speed_perturb is None:
            return waveform
        speed = random.choice(self.speed_perturb)
        if speed == 1.0:
            return waveform

        x = jnp.asarray(waveform, dtype=jnp.float32).reshape(-1)
        n_in = int(x.shape[0])
        if n_in == 0:
            return x

        # sox 'speed s' relabels the rate to fs*s; 'rate fs' resamples back.
        orig_freq = int(round(fs * speed))
        new_freq = int(fs)
        g = math.gcd(orig_freq, new_freq)
        orig, new = orig_freq // g, new_freq // g

        kern, width = _sinc_resample_kernel(orig, new)       # (new, kwidth)
        kwidth = kern.shape[1]                               # = 2*width + orig
        out_len = int(math.ceil(new * n_in / orig))
        n_frames = -(-out_len // new)                        # ceil

        # --- shapes for the Pallas matmul ---------------------------------
        kw_p = ((kwidth + 7) // 8) * 8                       # sublane-friendly K
        tm = min(_MAX_TM, ((n_frames + 7) // 8) * 8)         # MXU M per tile
        n_frames_p = ((n_frames + tm - 1) // tm) * tm
        new_p = ((new + _LANES - 1) // _LANES) * _LANES      # lane-dense output
        nblk = -(-kw_p // orig)                              # shifted-slice count

        # --- build the (n_frames_p, kw_p) frame matrix ON DEVICE ----------
        # frames[j, k] = x_ext[j*orig + k], x_ext = [0]*width ++ x ++ zeros.
        total = (n_frames_p + nblk) * orig
        x_ext = jnp.zeros((total,), self.compute_dtype)
        x_ext = x_ext.at[width:width + n_in].set(x.astype(self.compute_dtype))
        X = x_ext.reshape(n_frames_p + nblk, orig)
        frames = jnp.concatenate(
            [X[a:a + n_frames_p] for a in range(nblk)], axis=1)[:, :kw_p]
        # (extra columns beyond kwidth hit zero filter rows -> no effect)

        # --- tiny padded filter (kw_p, new_p); zero padding is exact ------
        kt = np.zeros((kw_p, new_p), dtype=np.float32)
        kt[:kwidth, :new] = kern.T
        kt = jnp.asarray(kt).astype(self.compute_dtype)

        out = _polyphase_resample_pallas(frames, kt, tm)     # (n_frames_p, new_p) f32
        y = out[:, :new].reshape(-1)[:out_len]
        return y

    __call__ = forward


# ----------------------------------------------------------------------------
# Pure numpy reference (used only for the self-test below)
# ----------------------------------------------------------------------------
def _reference_resample(x_np: np.ndarray, orig: int, new: int) -> np.ndarray:
    kern, width = _sinc_resample_kernel(orig, new)
    kwidth = kern.shape[1]
    n_in = x_np.shape[0]
    out_len = int(math.ceil(new * n_in / orig))
    n_frames = -(-out_len // new)
    x_ext = np.zeros(n_frames * orig + kwidth, np.float64)
    x_ext[width:width + n_in] = x_np
    frames = np.stack([x_ext[j * orig: j * orig + kwidth] for j in range(n_frames)])
    return (frames @ kern.T.astype(np.float64)).reshape(-1)[:out_len]


# ----------------------------------------------------------------------------
if __name__ == "__main__":
    key = jax.random.PRNGKey(0)
    N, fs = 1024, 16000
    waveform = jax.random.normal(key, (N,), dtype=jnp.float32)
    x_np = np.asarray(waveform, dtype=np.float64)

    # exercise both perturbation factors deterministically
    for speed in (0.9, 1.1):
        module = SpeechPreprocessSpeedPerturb(speed_perturb=[speed])
        out = jax.block_until_ready(module.forward(waveform, fs))
        assert out.ndim == 1 and out.dtype == jnp.float32
        assert bool(jnp.all(jnp.isfinite(out)))
        g = math.gcd(int(round(fs * speed)), fs)
        ref = _reference_resample(x_np, int(round(fs * speed)) // g, fs // g)
        assert out.shape[0] == ref.shape[0], (out.shape, ref.shape)
        err = float(jnp.max(jnp.abs(out - jnp.asarray(ref, jnp.float32))))
        assert err < 1e-1, f"max abs error {err}"

    # passthrough branches
    assert SpeechPreprocessSpeedPerturb(speed_perturb=None).forward(waveform, fs) is waveform
    random.seed(0)
    module = SpeechPreprocessSpeedPerturb(speed_perturb=[0.9, 1.0, 1.1])
    _ = jax.block_until_ready(jnp.asarray(module.forward(waveform, fs)))

    print("KERNEL_OK")
</pallas_src>

<mosaic_0001>
module attributes {stable_mosaic.version = 11 : i64} {
  func.func @_poly_matmul_kernel(%arg0: i32, %arg1: memref<120x24xbf16, #tpu.memory_space<vmem>>, %arg2: memref<24x128xbf16, #tpu.memory_space<vmem>>, %arg3: memref<120x128xf32, #tpu.memory_space<vmem>>) attributes {dimension_semantics = [#tpu.dimension_semantics<parallel>], iteration_bounds = array<i64: 1>, scalar_prefetch = 0 : i64, scratch_operands = 0 : i64, tpu.core_type = #tpu.core_type<tc>, window_params = [{transform_indices = @transform_0, window_bounds = array<i64: 120, 24>}, {pipeline_mode = #tpu.pipeline_mode<synchronous>, transform_indices = @transform_1, window_bounds = array<i64: 24, 128>}, {transform_indices = @transform_2, window_bounds = array<i64: 120, 128>}]} {
    %c0 = arith.constant 0 : index
    %c0_0 = arith.constant 0 : index
    %0 = vector.load %arg1[%c0, %c0_0] : memref<120x24xbf16, #tpu.memory_space<vmem>>, vector<120x24xbf16>
    %c0_1 = arith.constant 0 : index
    %c0_2 = arith.constant 0 : index
    %1 = vector.load %arg2[%c0_1, %c0_2] : memref<24x128xbf16, #tpu.memory_space<vmem>>, vector<24x128xbf16>
    %cst = arith.constant dense<0.000000e+00> : vector<120x128xf32>
    %2 = tpu.matmul %0, %1, %cst {dimension_numbers = #tpu.dot_dimension_numbers<[1], [0], [0], [1], [0, 0, 1, 1], [], []>} : vector<120x24xbf16>, vector<24x128xbf16>, vector<120x128xf32> -> vector<120x128xf32>
    %c0_3 = arith.constant 0 : index
    %c0_4 = arith.constant 0 : index
    %3 = vector.load %arg3[%c0_3, %c0_4] : memref<120x128xf32, #tpu.memory_space<vmem>>, vector<120x128xf32>
    tpu.vector_store %arg3[%c0_3, %c0_4], %2 {strides = array<i32>} : memref<120x128xf32, #tpu.memory_space<vmem>>, vector<120x128xf32>,
    return
  }
  func.func @transform_0(%arg0: i32) -> (i32, i32) {
    %c0_i32 = arith.constant 0 : i32
    %c0_i32_0 = arith.constant 0 : i32
    return %arg0, %c0_i32 : i32, i32
  }
  func.func @transform_1(%arg0: i32) -> (i32, i32) {
    %c0_i32 = arith.constant 0 : i32
    %c0_i32_0 = arith.constant 0 : i32
    %c0_i32_1 = arith.constant 0 : i32
    return %c0_i32, %c0_i32_0 : i32, i32
  }
  func.func @transform_2(%arg0: i32) -> (i32, i32) {
    %c0_i32 = arith.constant 0 : i32
    %c0_i32_0 = arith.constant 0 : i32
    return %arg0, %c0_i32 : i32, i32
  }
}

</mosaic_0001>

<bundles_post_ra>
// kernel: tpu_custom_call.1
= control target key start
LH: loop header
LB: loop body
LE: loop exit
PB: predicated region body
PF: predicated region fallthrough
CT: control target
= control target key end

     0   :  { %vm103_vm0 = vcmask 1043456   ;;  %vm78_vm1 = vcmask 195584   ;;  %s393_s0 = inlined_call_operand.vmem [shape: bf16[120,24], index: 0, kind: input, shape index: {}]   ;;  %s394_s1 = inlined_call_operand.vmem [shape: bf16[24,128], index: 1, kind: input, shape index: {}]   ;;  %s395_s2 = inlined_call_operand.hbm [shape: f32[120,128], index: 2, kind: output, shape index: {}]  }
   0x1   :  { %v291_v0 = vld [vmem:[%s394_s1] sm:$0xff]   ;;  %v292_v1 = vld [vmem:[%s394_s1 + $0x8] ss:$0 sps:$4 sm:$0xff]   ;;  %v297_v7 = vld [vmem:[%s393_s0 + $0x10] sm:$0xff]  }
   0x2   :  { %262 = vmatprep.subr.bf16.mxu0 %v291_v0  ;;  %282 = vmatprep.subr.bf16.mxu1 %v291_v0  ;;  %v293_v2 = vld [vmem:[%s393_s0] sm:$0xff]   ;;  %v105_v4 = vsel %vm103_vm0, %v292_v1, 0  ;;  %v295_v5 = vld [vmem:[%s393_s0 + $0x8] sm:$0xff]   ;;  %v298_v8 = vld [vmem:[%s393_s0 + $0x30] sm:$0xff]  }
   0x3   :  { %263 = vmatpush3.bf16.msra.mxu0 %v291_v0  ;;  %284 = vmatpush3.bf16.msra.mxu1 %v291_v0  ;;  %v294_v3 = vld [vmem:[%s393_s0 + $0x20] sm:$0xff]   ;;  %v296_v6 = vld [vmem:[%s393_s0 + $0x28] sm:$0xff]  }
   0x4   :  { %286 = vmatprep.subr.msk.bf16.mxu0 %vm103_vm0, %v292_v1  ;;  %287 = vmatprep.subr.msk.bf16.mxu1 %vm103_vm0, %v292_v1 }
   0x5   :  { %266 = vmatprep.mubr.msk.bf16.mxu0 %vm78_vm1, %v293_v2  ;;  %274 = vmatprep.mubr.msk.bf16.mxu1 %vm78_vm1, %v294_v3 }
   0x7   :  { %265 = vmatpush3.bf16.msra.mxu0 %v105_v4  ;;  %285 = vmatpush3.bf16.msra.mxu1 %v105_v4 }
   0x8   :  { %7 = vsyncpa [#allocation3], 0  ;;  %v299_v9 = vld [vmem:[%s393_s0 + $0x18] sm:$0xff]  }
   0x9   :  { %v300_v10 = vld [vmem:[%s393_s0 + $0x38] ss:$0 sps:$4 sm:$0xff]   ;;  %s325_s0 = smov [#allocation2]  }
   0xa   :  { %267 = vmatmul.mubr.msk.bf16.vlgmr.msra.gmra.mrb[0].mxu0 %vm78_vm1, %v295_v5  ;;  %275 = vmatmul.mubr.msk.bf16.vlgmr.msra.gmra.mrb[0].mxu1 %vm78_vm1, %v296_v6  ;;  %s223_s28 = sshll.u32 %s325_s0, 4  ;;  %s224_s28 = int_to_ptr.vmem [resolvable:$true] %s223_s28 }
   0xb   :  { %270 = vmatprep.mubr.msk.bf16.mxu0 %vm78_vm1, %v297_v7  ;;  %278 = vmatprep.mubr.msk.bf16.mxu1 %vm78_vm1, %v298_v8  ;;  %s301_s29 = scalar_lea.vmem %s224_s28, 1920  ;;  %p306_p1 = scmp.lt.s32.totalorder %s224_s28, %s224_s28 }
   0xc   :  { %p302_p0 = scmp.ne.s32.totalorder %s224_s28, %s301_s29  ;;  %p307_p2 = scmp.lt.s32.totalorder %s301_s29, %s301_s29 }
   0xe   :  { %p308_p3 = por %p307_p2, %p306_p1 }
  0x10   :  { %p309_p4 = pnand %p308_p3, %p302_p0 }
  0x12   :  { %271 = vmatmul.mubr.msk.bf16.gmra.mrb[4].mxu0 %vm78_vm1, %v299_v9  ;;  %279 = vmatmul.mubr.msk.bf16.gmra.mrb[4].mxu1 %vm78_vm1, %v300_v10 }
  0xdd   :  { %v268_v11 = vpop.f32.mrb[0].mxu0  ;;  %v276_v12 = vpop.f32.mrb[0].mxu1 }
  0xde   :  { %205 = vst [vmem:[#allocation2 + $0x10] sm:$0xff] %v268_v11  ;;  %213 = vst [vmem:[#allocation2 + $0x50] sm:$0xff] %v276_v12  ;;  %v141_v13 = vpop.f32.mrb[1].mxu0  ;;  %v173_v14 = vpop.f32.mrb[1].mxu1 }
  0xdf   :  { %203 = vst [vmem:[#allocation2] sm:$0xff] %v141_v13  ;;  %211 = vst [vmem:[#allocation2 + $0x40] sm:$0xff] %v173_v14  ;;  %v269_v15 = vpop.f32.mrb[2].mxu0  ;;  %v277_v16 = vpop.f32.mrb[2].mxu1 }
  0xe0   :  { %206 = vst [vmem:[#allocation2 + $0x18] sm:$0xff] %v269_v15  ;;  %214 = vst [vmem:[#allocation2 + $0x58] sm:$0xff] %v277_v16  ;;  %v144_v17 = vpop.f32.mrb[3].mxu0  ;;  %v176_v18 = vpop.f32.mrb[3].mxu1 }
  0xe1   :  { %204 = vst [vmem:[#allocation2 + $0x8] sm:$0xff] %v144_v17  ;;  %212 = vst [vmem:[#allocation2 + $0x48] sm:$0xff] %v176_v18 }
  0xe5   :  { %v272_v19 = vpop.f32.mrb[4].mxu0  ;;  %v280_v20 = vpop.f32.mrb[4].mxu1 }
  0xe6   :  { %209 = vst [vmem:[#allocation2 + $0x30] sm:$0xff] %v272_v19  ;;  %217 = vst [vmem:[#allocation2 + $0x70] sm:$0xff] %v280_v20  ;;  %v157_v21 = vpop.f32.mrb[5].mxu0  ;;  %v189_v22 = vpop.f32.mrb[5].mxu1 }
  0xe7   :  { %207 = vst [vmem:[#allocation2 + $0x20] sm:$0xff] %v157_v21  ;;  %215 = vst [vmem:[#allocation2 + $0x60] sm:$0xff] %v189_v22  ;;  %v273_v23 = vpop.f32.mrb[6].mxu0  ;;  %v281_v24 = vpop.f32.mrb[6].mxu1 }
  0xe8   :  { %210 = vst [vmem:[#allocation2 + $0x38] sm:$0xff] %v273_v23  ;;  %v160_v25 = vpop.f32.mrb[7].mxu0  ;;  %v192_v26 = vpop.f32.mrb[7].mxu1 }
  0xe9   :  { %208 = vst [vmem:[#allocation2 + $0x28] sm:$0xff] %v160_v25  ;;  %216 = vst [vmem:[#allocation2 + $0x68] sm:$0xff] %v192_v26 }
  0xea   :  { %312 = shalt.err (!%p309_p4)
}
  0xeb   :  { %s313_s4 = scalar_lea.hbm %s395_s2, 1920 }
  0xec   :  { %p314_p5 = scmp.ne.s32.totalorder %s395_s2, %s313_s4  ;;  %p317_p6 = scmp.lt.u32.totalorder %s313_s4, %s395_s2 }
  0xee   :  { %p319_p7 = pnand %p317_p6, %p314_p5 }
  0xf0   :  { %322 = shalt.err (!%p319_p7)
}
  0xf1   :  { %s326_s9 = smov 128   ;;  %s327_s10 = smov 8  }
  0xf2   :  { %229 = dma.vmem_to_hbm [thread:$0]  %s224_s28, 1920, %s395_s2, [#allocation3], %s326_s9, %s326_s9, %s327_s10  }
  0xf3   :  { %323 = dma.done.wait [#allocation3], 1920  }
  0xf4   :  { %324 = vsyncadd [#allocation3], 4294965376 }
  0xf5   :  { %233 = vsyncpa [#allocation3], 1 }

</bundles_post_ra>
